<compile_context>
chip_gen: v5e
topology: v5e:2x2
jax: 0.10.0
libtpu: 0.0.40
codegen_flags: <defaults>
</compile_context>

<pallas_src>
import functools

import jax
import jax.numpy as jnp
from jax.experimental import pallas as pl
from jax.experimental.pallas import tpu as pltpu


def multihop_kernel(x_ref, w_ref, wh_ref, out_ref):
    """x_ref: (TB,S,H) compute dtype; w_ref: (4,H,H) compute dtype;
    wh_ref: (2,H) f32; out_ref: (TB, 3H) f32."""
    tb, S, H = x_ref.shape

    x_cd = x_ref[...]                          # (TB, S, H) compute dtype
    x_f32 = x_cd.astype(jnp.float32)           # f32 copy for pooling / weighted sum
    x2 = x_cd.reshape(tb * S, H)               # one large MXU tile per hop

    wh = wh_ref[...]                           # (2, H) f32
    wh1 = wh[0:1, :]                           # (1, H)
    wh2 = wh[1:2, :]

    mean_x = jnp.mean(x_f32, axis=1)           # (TB, H) f32
    u0 = mean_x                                # u_att[0]
    m0 = mean_x                                # m_u[0]

    def hop(m, w_cd, wm_cd, wh_row):
        # (TB*S, H) @ (H, H) on the MXU, f32 accumulation.
        M = jnp.tanh(jnp.dot(x2, w_cd, preferred_element_type=jnp.float32))
        g = jnp.tanh(jnp.dot(m.astype(w_cd.dtype), wm_cd,
                             preferred_element_type=jnp.float32))       # (TB, H)
        M = M.reshape(tb, S, H) * g[:, None, :]                          # (TB, S, H)
        # Score = M @ W_u_h as a lane reduction; result is lane-dense (TB, S).
        U = jnp.sum(M * wh_row[None, :, :], axis=-1)                     # (TB, S)
        U = U - jnp.max(U, axis=-1, keepdims=True)
        e = jnp.exp(U)
        alpha = e * pl.reciprocal(jnp.sum(e, axis=-1, keepdims=True), approx=True)
        return jnp.sum(x_f32 * alpha[:, :, None], axis=1)                # (TB, H)

    u1 = hop(m0, w_ref[0], w_ref[1], wh1)       # hop 1
    m1 = m0 + u0                                # m_u[1] = m_u[0] + u_att[0]
    u2 = hop(m1, w_ref[2], w_ref[3], wh2)       # hop 2

    out_ref[...] = jnp.concatenate([u0, u1, u2], axis=-1)                # (TB, 3H)


def multihop_attention(x, params, *, compute_dtype=jnp.bfloat16, tb=None):
    """x: (B, S, H) float32. Returns [u0, u1, u2], each (B, H) float32."""
    B, S, H = x.shape
    cd = jnp.dtype(compute_dtype)

    # ---- batch-tile selection -------------------------------------------
    if tb is None:
        rows_target = 256                                   # fill the MXU rows
        tb = max(1, -(-rows_target // S))
        # keep the (TB,S,H) x block around <= 4 MiB (double-buffered by Pallas)
        max_tb = max(1, (4 << 20) // max(1, S * H * cd.itemsize))
        tb = min(tb, max_tb)
    if tb >= B:
        tb = B                                              # full-dim block
    else:
        tb = max(8, -(-tb // 8) * 8)                        # sublane-aligned
        if tb >= B:
            tb = B
    n_blocks = pl.cdiv(B, tb)
    # v7x has two TensorCores: if everything landed in one block but there is
    # plenty of work, split into >=2 grid steps so both cores stay busy.
    if n_blocks == 1 and tb >= 16 and tb * S >= 512:
        tb = max(8, (-(-tb // 2) + 7) // 8 * 8)
        n_blocks = pl.cdiv(B, tb)
    B_pad = n_blocks * tb

    # ---- operand packing / casting --------------------------------------
    x_cd = x.astype(compute_dtype)
    if B_pad != B:
        x_cd = jnp.pad(x_cd, ((0, B_pad - B), (0, 0), (0, 0)))
    w_stack = jnp.stack(
        [params["W_u_1"], params["W_u_m_1"], params["W_u_2"], params["W_u_m_2"]],
        axis=0).astype(compute_dtype)                        # (4, H, H)
    wh_rows = jnp.concatenate(
        [params["W_u_h_1"].reshape(1, H), params["W_u_h_2"].reshape(1, H)],
        axis=0).astype(jnp.float32)                          # (2, H), lane-dense

    # ---- scheduling hints -------------------------------------------------
    itemsize = cd.itemsize
    x_block_bytes = tb * S * H * itemsize
    w_bytes = 4 * H * H * itemsize + 2 * H * 4
    out_block_bytes = tb * 3 * H * 4
    vmem_limit = int(min(max(2 * (x_block_bytes + w_bytes + out_block_bytes) + (16 << 20),
                             32 << 20), 128 << 20))
    flops = 2 * (2 * B_pad * S * H * H + 2 * B_pad * H * H)          # two hops
    transcendentals = 2 * (B_pad * S * H + B_pad * H + B_pad * S)    # tanh + exp
    bytes_accessed = (B_pad * S * H * itemsize + w_bytes + B_pad * 3 * H * 4)
    cost = pl.CostEstimate(flops=flops, transcendentals=transcendentals,
                           bytes_accessed=bytes_accessed)

    out = pl.pallas_call(
        multihop_kernel,
        out_shape=jax.ShapeDtypeStruct((B_pad, 3 * H), jnp.float32),
        grid=(n_blocks,),
        in_specs=[
            pl.BlockSpec((tb, S, H), lambda i: (i, 0, 0)),
            pl.BlockSpec((4, H, H), lambda i: (0, 0, 0)),
            pl.BlockSpec((2, H), lambda i: (0, 0)),
        ],
        out_specs=pl.BlockSpec((tb, 3 * H), lambda i: (i, 0)),
        compiler_params=pltpu.CompilerParams(
            dimension_semantics=("parallel",),
            vmem_limit_bytes=vmem_limit),
        cost_estimate=cost,
    )(x_cd, w_stack, wh_rows)

    u = out[:B]
    return [u[:, 0:H], u[:, H:2 * H], u[:, 2 * H:3 * H]]


def _reference(x, params):
    """Pure-JAX reference mirroring the PyTorch forward (qvector=None, num_steps=2)."""
    m0 = jnp.mean(x, axis=1)
    u0 = jnp.mean(x, axis=1)

    def hop(m, w, wm, wh):
        M = jnp.tanh(jnp.einsum("bsh,hk->bsk", x, w))
        M = M * jnp.tanh(m @ wm)[:, None, :]
        U = jnp.einsum("bsh,hk->bsk", M, wh)                 # (B, S, 1)
        alpha = jax.nn.softmax(U, axis=1)
        return jnp.sum(x * alpha, axis=1)

    u1 = hop(m0, params["W_u_1"], params["W_u_m_1"], params["W_u_h_1"])
    m1 = m0 + u0
    u2 = hop(m1, params["W_u_2"], params["W_u_m_2"], params["W_u_h_2"])
    return [u0, u1, u2]


def init_params(key, hidden_size):
    stdv = 0.1
    names = ["W_u_1", "W_u_m_1", "W_u_h_1", "W_u_2", "W_u_m_2", "W_u_h_2",
             "W_u_3", "W_u_m_3", "W_u_h_3"]
    keys = jax.random.split(key, len(names))
    params = {}
    for n, k in zip(names, keys):
        shape = (hidden_size, 1) if n.startswith("W_u_h") else (hidden_size, hidden_size)
        params[n] = jax.random.uniform(k, shape, jnp.float32, -stdv, stdv)
    return params


if __name__ == "__main__":
    B, S, H = 2, 8, 32
    key = jax.random.PRNGKey(0)
    kx, kp = jax.random.split(key)
    x = jax.random.normal(kx, (B, S, H), jnp.float32)
    params = init_params(kp, H)

    refs = _reference(x, params)

    # Semantics check: f32 compute path (only the approx softmax reciprocal differs).
    outs_f32 = jax.block_until_ready(
        multihop_attention(x, params, compute_dtype=jnp.float32))
    for o, r in zip(outs_f32, refs):
        assert o.shape == (B, H)
        assert jnp.allclose(o, r, atol=1e-3, rtol=1e-2), "f32 kernel mismatch vs reference"

    # Fast path: bf16 MXU inputs with f32 accumulation / pooling / softmax.
    outs_bf16 = jax.block_until_ready(
        multihop_attention(x, params, compute_dtype=jnp.bfloat16))
    for o, r in zip(outs_bf16, refs):
        assert o.shape == (B, H)
        assert jnp.allclose(o, r, atol=5e-2, rtol=5e-2), "bf16 kernel mismatch vs reference"

    print("KERNEL_OK")
</pallas_src>

<mosaic_0001>
module attributes {stable_mosaic.version = 11 : i64} {
  func.func @multihop_kernel(%arg0: i32, %arg1: memref<2x8x32xf32, #tpu.memory_space<vmem>>, %arg2: memref<4x32x32xf32, #tpu.memory_space<vmem>>, %arg3: memref<2x32xf32, #tpu.memory_space<vmem>>, %arg4: memref<2x96xf32, #tpu.memory_space<vmem>>) attributes {dimension_semantics = [#tpu.dimension_semantics<parallel>], iteration_bounds = array<i64: 1>, scalar_prefetch = 0 : i64, scratch_operands = 0 : i64, tpu.core_type = #tpu.core_type<tc>, window_params = [{transform_indices = @transform_0, window_bounds = array<i64: 2, 8, 32>}, {pipeline_mode = #tpu.pipeline_mode<synchronous>, transform_indices = @transform_1, window_bounds = array<i64: 4, 32, 32>}, {pipeline_mode = #tpu.pipeline_mode<synchronous>, transform_indices = @transform_2, window_bounds = array<i64: 2, 32>}, {transform_indices = @transform_3, window_bounds = array<i64: 2, 96>}]} {
    %c0 = arith.constant 0 : index
    %c0_0 = arith.constant 0 : index
    %c0_1 = arith.constant 0 : index
    %0 = vector.load %arg1[%c0, %c0_0, %c0_1] : memref<2x8x32xf32, #tpu.memory_space<vmem>>, vector<2x8x32xf32>
    %1 = vector.shape_cast %0 : vector<2x8x32xf32> to vector<16x32xf32>
    %c0_2 = arith.constant 0 : index
    %c0_3 = arith.constant 0 : index
    %2 = vector.load %arg3[%c0_2, %c0_3] : memref<2x32xf32, #tpu.memory_space<vmem>>, vector<2x32xf32>
    %3 = vector.extract_strided_slice %2 {offsets = [0, 0], sizes = [1, 32], strides = [1, 1]} : vector<2x32xf32> to vector<1x32xf32>
    %4 = vector.extract_strided_slice %2 {offsets = [1, 0], sizes = [1, 32], strides = [1, 1]} : vector<2x32xf32> to vector<1x32xf32>
    %cst = arith.constant dense<0.000000e+00> : vector<2x32xf32>
    %5 = vector.multi_reduction <add>, %0, %cst [1] : vector<2x8x32xf32> to vector<2x32xf32>
    %cst_4 = arith.constant 8.000000e+00 : f32
    %6 = vector.broadcast %cst_4 : f32 to vector<2x32xf32>
    %7 = arith.divf %5, %6 : vector<2x32xf32>
    %c0_5 = arith.constant 0 : index
    %c0_6 = arith.constant 0 : index
    %c0_7 = arith.constant 0 : index
    %8 = vector.load %arg2[%c0_5, %c0_6, %c0_7] : memref<4x32x32xf32, #tpu.memory_space<vmem>>, vector<1x32x32xf32>
    %9 = vector.shape_cast %8 : vector<1x32x32xf32> to vector<32x32xf32>
    %c1 = arith.constant 1 : index
    %c0_8 = arith.constant 0 : index
    %c0_9 = arith.constant 0 : index
    %10 = vector.load %arg2[%c1, %c0_8, %c0_9] : memref<4x32x32xf32, #tpu.memory_space<vmem>>, vector<1x32x32xf32>
    %11 = vector.shape_cast %10 : vector<1x32x32xf32> to vector<32x32xf32>
    %cst_10 = arith.constant dense<0.000000e+00> : vector<16x32xf32>
    %12 = tpu.matmul %1, %9, %cst_10 {dimension_numbers = #tpu.dot_dimension_numbers<[1], [0], [0], [1], [0, 0, 1, 1], [], []>} : vector<16x32xf32>, vector<32x32xf32>, vector<16x32xf32> -> vector<16x32xf32>
    %13 = math.tanh %12 : vector<16x32xf32>
    %cst_11 = arith.constant dense<0.000000e+00> : vector<2x32xf32>
    %14 = tpu.matmul %7, %11, %cst_11 {dimension_numbers = #tpu.dot_dimension_numbers<[1], [0], [0], [1], [0, 0, 1, 1], [], []>} : vector<2x32xf32>, vector<32x32xf32>, vector<2x32xf32> -> vector<2x32xf32>
    %15 = math.tanh %14 : vector<2x32xf32>
    %16 = vector.shape_cast %13 : vector<16x32xf32> to vector<2x8x32xf32>
    %17 = vector.shape_cast %15 : vector<2x32xf32> to vector<2x1x32xf32>
    %18 = vector.broadcast %17 : vector<2x1x32xf32> to vector<2x8x32xf32>
    %19 = arith.mulf %16, %18 : vector<2x8x32xf32>
    %20 = vector.shape_cast %3 : vector<1x32xf32> to vector<1x1x32xf32>
    %21 = vector.broadcast %20 : vector<1x1x32xf32> to vector<2x8x32xf32>
    %22 = arith.mulf %19, %21 : vector<2x8x32xf32>
    %cst_12 = arith.constant dense<0.000000e+00> : vector<2x8xf32>
    %23 = vector.multi_reduction <add>, %22, %cst_12 [2] : vector<2x8x32xf32> to vector<2x8xf32>
    %cst_13 = arith.constant dense<0xFF800000> : vector<2xf32>
    %24 = vector.multi_reduction <maximumf>, %23, %cst_13 [1] : vector<2x8xf32> to vector<2xf32>
    %25 = vector.shape_cast %24 : vector<2xf32> to vector<2x1xf32>
    %26 = vector.broadcast %25 : vector<2x1xf32> to vector<2x8xf32>
    %27 = arith.subf %23, %26 : vector<2x8xf32>
    %28 = math.exp %27 : vector<2x8xf32>
    %cst_14 = arith.constant dense<0.000000e+00> : vector<2xf32>
    %29 = vector.multi_reduction <add>, %28, %cst_14 [1] : vector<2x8xf32> to vector<2xf32>
    %30 = vector.shape_cast %29 : vector<2xf32> to vector<2x1xf32>
    %31 = tpu.reciprocal %30 {approx = true} : vector<2x1xf32> -> vector<2x1xf32>
    %32 = vector.broadcast %31 : vector<2x1xf32> to vector<2x8xf32>
    %33 = arith.mulf %28, %32 : vector<2x8xf32>
    %34 = vector.shape_cast %33 : vector<2x8xf32> to vector<2x8x1xf32>
    %35 = vector.broadcast %34 : vector<2x8x1xf32> to vector<2x8x32xf32>
    %36 = arith.mulf %0, %35 : vector<2x8x32xf32>
    %cst_15 = arith.constant dense<0.000000e+00> : vector<2x32xf32>
    %37 = vector.multi_reduction <add>, %36, %cst_15 [1] : vector<2x8x32xf32> to vector<2x32xf32>
    %38 = arith.addf %7, %7 : vector<2x32xf32>
    %c2 = arith.constant 2 : index
    %c0_16 = arith.constant 0 : index
    %c0_17 = arith.constant 0 : index
    %39 = vector.load %arg2[%c2, %c0_16, %c0_17] : memref<4x32x32xf32, #tpu.memory_space<vmem>>, vector<1x32x32xf32>
    %40 = vector.shape_cast %39 : vector<1x32x32xf32> to vector<32x32xf32>
    %c3 = arith.constant 3 : index
    %c0_18 = arith.constant 0 : index
    %c0_19 = arith.constant 0 : index
    %41 = vector.load %arg2[%c3, %c0_18, %c0_19] : memref<4x32x32xf32, #tpu.memory_space<vmem>>, vector<1x32x32xf32>
    %42 = vector.shape_cast %41 : vector<1x32x32xf32> to vector<32x32xf32>
    %cst_20 = arith.constant dense<0.000000e+00> : vector<16x32xf32>
    %43 = tpu.matmul %1, %40, %cst_20 {dimension_numbers = #tpu.dot_dimension_numbers<[1], [0], [0], [1], [0, 0, 1, 1], [], []>} : vector<16x32xf32>, vector<32x32xf32>, vector<16x32xf32> -> vector<16x32xf32>
    %44 = math.tanh %43 : vector<16x32xf32>
    %cst_21 = arith.constant dense<0.000000e+00> : vector<2x32xf32>
    %45 = tpu.matmul %38, %42, %cst_21 {dimension_numbers = #tpu.dot_dimension_numbers<[1], [0], [0], [1], [0, 0, 1, 1], [], []>} : vector<2x32xf32>, vector<32x32xf32>, vector<2x32xf32> -> vector<2x32xf32>
    %46 = math.tanh %45 : vector<2x32xf32>
    %47 = vector.shape_cast %44 : vector<16x32xf32> to vector<2x8x32xf32>
    %48 = vector.shape_cast %46 : vector<2x32xf32> to vector<2x1x32xf32>
    %49 = vector.broadcast %48 : vector<2x1x32xf32> to vector<2x8x32xf32>
    %50 = arith.mulf %47, %49 : vector<2x8x32xf32>
    %51 = vector.shape_cast %4 : vector<1x32xf32> to vector<1x1x32xf32>
    %52 = vector.broadcast %51 : vector<1x1x32xf32> to vector<2x8x32xf32>
    %53 = arith.mulf %50, %52 : vector<2x8x32xf32>
    %cst_22 = arith.constant dense<0.000000e+00> : vector<2x8xf32>
    %54 = vector.multi_reduction <add>, %53, %cst_22 [2] : vector<2x8x32xf32> to vector<2x8xf32>
    %cst_23 = arith.constant dense<0xFF800000> : vector<2xf32>
    %55 = vector.multi_reduction <maximumf>, %54, %cst_23 [1] : vector<2x8xf32> to vector<2xf32>
    %56 = vector.shape_cast %55 : vector<2xf32> to vector<2x1xf32>
    %57 = vector.broadcast %56 : vector<2x1xf32> to vector<2x8xf32>
    %58 = arith.subf %54, %57 : vector<2x8xf32>
    %59 = math.exp %58 : vector<2x8xf32>
    %cst_24 = arith.constant dense<0.000000e+00> : vector<2xf32>
    %60 = vector.multi_reduction <add>, %59, %cst_24 [1] : vector<2x8xf32> to vector<2xf32>
    %61 = vector.shape_cast %60 : vector<2xf32> to vector<2x1xf32>
    %62 = tpu.reciprocal %61 {approx = true} : vector<2x1xf32> -> vector<2x1xf32>
    %63 = vector.broadcast %62 : vector<2x1xf32> to vector<2x8xf32>
    %64 = arith.mulf %59, %63 : vector<2x8xf32>
    %65 = vector.shape_cast %64 : vector<2x8xf32> to vector<2x8x1xf32>
    %66 = vector.broadcast %65 : vector<2x8x1xf32> to vector<2x8x32xf32>
    %67 = arith.mulf %0, %66 : vector<2x8x32xf32>
    %cst_25 = arith.constant dense<0.000000e+00> : vector<2x32xf32>
    %68 = vector.multi_reduction <add>, %67, %cst_25 [1] : vector<2x8x32xf32> to vector<2x32xf32>
    %69 = tpu.concatenate %7, %37, %68 in 1 : vector<2x32xf32>, vector<2x32xf32>, vector<2x32xf32> -> vector<2x96xf32>
    %c0_26 = arith.constant 0 : index
    %c0_27 = arith.constant 0 : index
    %70 = vector.load %arg4[%c0_26, %c0_27] : memref<2x96xf32, #tpu.memory_space<vmem>>, vector<2x96xf32>
    tpu.vector_store %arg4[%c0_26, %c0_27], %69 {strides = array<i32>} : memref<2x96xf32, #tpu.memory_space<vmem>>, vector<2x96xf32>,
    return
  }
  func.func @transform_0(%arg0: i32) -> (i32, i32, i32) {
    %c0_i32 = arith.constant 0 : i32
    %c0_i32_0 = arith.constant 0 : i32
    %c0_i32_1 = arith.constant 0 : i32
    return %arg0, %c0_i32, %c0_i32_0 : i32, i32, i32
  }
  func.func @transform_1(%arg0: i32) -> (i32, i32, i32) {
    %c0_i32 = arith.constant 0 : i32
    %c0_i32_0 = arith.constant 0 : i32
    %c0_i32_1 = arith.constant 0 : i32
    %c0_i32_2 = arith.constant 0 : i32
    return %c0_i32, %c0_i32_0, %c0_i32_1 : i32, i32, i32
  }
  func.func @transform_2(%arg0: i32) -> (i32, i32) {
    %c0_i32 = arith.constant 0 : i32
    %c0_i32_0 = arith.constant 0 : i32
    %c0_i32_1 = arith.constant 0 : i32
    return %c0_i32, %c0_i32_0 : i32, i32
  }
  func.func @transform_3(%arg0: i32) -> (i32, i32) {
    %c0_i32 = arith.constant 0 : i32
    %c0_i32_0 = arith.constant 0 : i32
    return %arg0, %c0_i32 : i32, i32
  }
}

</mosaic_0001>

<bundles_post_ra>
// kernel: tpu_custom_call.1
= control target key start
LH: loop header
LB: loop body
LE: loop exit
PB: predicated region body
PF: predicated region fallthrough
CT: control target
= control target key end

     0   :  { %8 = vsyncpa [#allocation3], 0  ;;  %s664_s0 = inlined_call_operand.hbm [shape: f32[2,8,32], index: 0, kind: input, shape index: {}]   ;;  %s665_s1 = inlined_call_operand.hbm [shape: f32[4,32,32], index: 1, kind: input, shape index: {}]   ;;  %s666_s2 = inlined_call_operand.hbm [shape: f32[2,32], index: 2, kind: input, shape index: {}]   ;;  %s667_s3 = inlined_call_operand.hbm [shape: f32[2,96], index: 3, kind: output, shape index: {}]  }
   0x1   :  { %9 = vsyncpa [#allocation6], 0 }
   0x2   :  { %10 = vsyncpa [#allocation4], 0  ;;  %s28_s14 = sshll.u32 %s665_s1, 4  ;;  %s575_s15 = smov [#allocation5]   ;;  %s29_s14 = int_to_ptr.hbm [resolvable:$true] %s28_s14 }
   0x3   :  { %s30_s16 = sshll.u32 %s575_s15, 4  ;;  %s15_s19 = sshll.u32 %s664_s0, 4  ;;  %s31_s16 = int_to_ptr.vmem [resolvable:$true] %s30_s16  ;;  %s16_s19 = int_to_ptr.hbm [resolvable:$true] %s15_s19 }
   0x4   :  { %s576_s20 = smov 128   ;;  %s577_s21 = smov 8  }
   0x5   :  { %36 = dma.hbm_to_vmem [thread:$0]  %s29_s14, 2048, %s31_s16, [#allocation6], %s576_s20, %s576_s20, %s577_s21  }
   0x6   :  { %s578_s22 = smov [#allocation2]   ;;  %s42_s26 = sshll.u32 %s666_s2, 4  ;;  %s43_s26 = int_to_ptr.hbm [resolvable:$true] %s42_s26 }
   0x7   :  { %s17_s23 = sshll.u32 %s578_s22, 4  ;;  %s579_s1 = smov [#allocation7]   ;;  %s18_s23 = int_to_ptr.vmem [resolvable:$true] %s17_s23 }
   0x8   :  { %23 = dma.hbm_to_vmem [thread:$0]  %s16_s19, 256, %s18_s23, [#allocation3], %s576_s20, %s576_s20, %s577_s21  }
   0x9   :  { %s44_s27 = sshll.u32 %s579_s1, 4  ;;  %s45_s27 = int_to_ptr.vmem [resolvable:$true] %s44_s27 }
   0xa   :  { %47 = dma.hbm_to_vmem [thread:$0]  %s43_s26, 32, %s45_s27, [#allocation6]  }
   0xb   :  { %569 = dma.done.wait [#allocation3], 256  }
   0xc   :  { %570 = vsyncadd [#allocation3], 4294967040 }
   0xd   :  { %571 = dma.done.wait [#allocation6], 2080  }
   0xe   :  { %572 = vsyncadd [#allocation6], 4294965216  ;;  %v580_v0 = vmov 8.0   ;;  %v90_v2 = vld [vmem:[#allocation5 + $0x18] sm:$0xff]  ;;  %v89_v3 = vld [vmem:[#allocation5 + $0x10] sm:$0xff]  ;;  %vm63_vm0 = vcmask 261120  }
   0xf   :  { %447 = vrcp.f32 %v580_v0  ;;  %114 = vmatpush.msra.mxu0 %v90_v2  ;;  %v88_v4 = vld [vmem:[#allocation5 + $0x8] sm:$0xff]  ;;  %v95_v5 = vld [vmem:[#allocation5 + $0x38] sm:$0xff]  ;;  %v94_v6 = vld [vmem:[#allocation5 + $0x30] sm:$0xff]  ;;  %vm129_vm2 = vcmask 1041409   ;;  %vm179_vm3 = vcmask 58368   ;;  %s582_s0 = smov 32  }
  0x10   :  { %145 = vmatpush.msra.mxu1 %v95_v5  ;;  %v87_v8 = vld [vmem:[#allocation5] sm:$0xff]  ;;  %v254_v9 = vld [vmem:[#allocation5 + $0x78] sm:$0xff]  ;;  %v614_v10 = vld [vmem:[#allocation2] sm:$0xff]  ;;  %s583_s2 = smov 64   ;;  %s584_s28 = smov [#allocation8]   ;;  %vm406_vm4 = vcmask 523264  }
  0x11   :  { %115 = vmatpush.msra.mxu0 %v89_v3  ;;  %297 = vmatpush.msra.mxu3 %v254_v9  ;;  %v64_v11 = vsel %vm63_vm0, %v614_v10, 0.0  ;;  %v93_v12 = vld [vmem:[#allocation5 + $0x28] sm:$0xff]  ;;  %v249_v13 = vld [vmem:[#allocation5 + $0x58] sm:$0xff]  ;;  %v253_v14 = vld [vmem:[#allocation5 + $0x70] sm:$0xff]  ;;  %s415_s29 = sshll.u32 %s584_s28, 4  ;;  %s417_s5 = sshll.u32 %s667_s3, 4  ;;  %s416_s29 = int_to_ptr.vmem [resolvable:$true] %s415_s29  ;;  %s418_s5 = int_to_ptr.hbm [resolvable:$true] %s417_s5 }
  0x12   :  { %146 = vmatpush.msra.mxu1 %v94_v6  ;;  %v65_v16 = vrot.slane %v64_v11, 4  ;;  %267 = vmatpush.msra.mxu2 %v249_v13  ;;  %v248_v17 = vld [vmem:[#allocation5 + $0x50] sm:$0xff]  ;;  %v252_v18 = vld [vmem:[#allocation5 + $0x68] sm:$0xff]  ;;  %v618_v19 = vld [vmem:[#allocation2 + $0x8] sm:$0xff]  ;;  %vm408_vm5 = vcmask 779264  }
  0x13   :  { %116 = vmatpush.msra.mxu0 %v88_v4  ;;  %298 = vmatpush.msra.mxu3 %v253_v14  ;;  %v92_v20 = vld [vmem:[#allocation5 + $0x20] sm:$0xff]  ;;  %v71_v21 = vsel %vm63_vm0, %v618_v19, 0.0  ;;  %v247_v25 = vld [vmem:[#allocation5 + $0x48] sm:$0xff] }
  0x14   :  { %147 = vmatpush.msra.mxu1 %v93_v12  ;;  %268 = vmatpush.msra.mxu2 %v248_v17  ;;  %v66_v23 = vadd.f32 %v65_v16, %v64_v11  ;;  %v72_v24 = vrot.slane %v71_v21, 4  ;;  %v251_v26 = vld [vmem:[#allocation5 + $0x60] sm:$0xff]  ;;  %v173_v16 = vlaneseq }
  0x15   :  { %v448_v1 = vpop.eup %447  ;;  %117 = vmatpush.msra.mxu0 %v87_v8  ;;  %299 = vmatpush.msra.mxu3 %v252_v18  ;;  %v246_v29 = vld [vmem:[#allocation5 + $0x40] sm:$0xff] }
  0x16   :  { %v79_v7 = vmul.f32 8.0, %v448_v1  ;;  %428 = vmatmul.msk.f32.vlgmr.msra.gmra.mxu0 %vm63_vm0, %v614_v10  ;;  %148 = vmatpush.msra.mxu1 %v92_v20  ;;  %v67_v27 = vrot.slane %v66_v23, 2  ;;  %v73_v28 = vadd.f32 %v72_v24, %v71_v21  ;;  %vm83_vm1 = vweird.f32 %v448_v1  ;;  %v62_v49 = vld [vmem:[#allocation7] sm:$0x3] }
  0x17   :  { %269 = vmatpush.msra.mxu2 %v247_v25  ;;  %300 = vmatpush.msra.mxu3 %v251_v26  ;;  %v162_v55 = vperm.slane %v62_v49, 0  ;;  %v314_v3 = vperm.slane %v62_v49, 1  ;;  %v174_v17 = vand.u32 127, %v173_v16 }
  0x18   :  { %v80_v15 = vsub.f32 1.0, %v79_v7  ;;  %v68_v31 = vadd.f32 %v67_v27, %v66_v23  ;;  %v74_v32 = vrot.slane %v73_v28, 2 }
  0x19   :  { %270 = vmatpush.msra.mxu2 %v246_v29 }
  0x1a   :  { %v81_v22 = vmul.f32 %v448_v1, %v80_v15  ;;  %v69_v33 = vrot.slane %v68_v31, 1  ;;  %v75_v34 = vadd.f32 %v74_v32, %v73_v28  ;;  %431 = vmatmul.msk.f32.vlgmr.msra.gmra.mxu2 %vm63_vm0, %v614_v10 }
  0x1c   :  { %v82_v30 = vadd.f32 %v448_v1, %v81_v22  ;;  %v70_v36 = vadd.f32 %v69_v33, %v68_v31  ;;  %v76_v37 = vrot.slane %v75_v34, 1 }
  0x1e   :  { %v84_v35 = vsel %vm83_vm1, %v448_v1, %v82_v30  ;;  %v77_v38 = vadd.f32 %v76_v37, %v75_v34  ;;  %429 = vmatmul.msk.f32.gmra.mxu0 %vm63_vm0, %v618_v19  ;;  %v581_v30 = vmov 0  }
  0x1f   :  { %v85_v39 = vmul.f32 %v84_v35, %v70_v36  ;;  %445 = vset.pattern.permute.xlu1 %v581_v30  ;;  %444 = vset.pattern.permute.xlu0 %v581_v30 }
  0x20   :  { %v86_v40 = vmul.f32 %v84_v35, %v77_v38  ;;  %446 = vset.pattern.permute.xlu2 %v581_v30 }
  0x21   :  { %v243_v41 = vadd.f32 %v85_v39, %v85_v39 }
  0x22   :  { %v629_v42 = vsel %vm129_vm2, %v86_v40, %v85_v39  ;;  %v244_v43 = vadd.f32 %v86_v40, %v86_v40  ;;  %432 = vmatmul.msk.f32.gmra.mxu2 %vm63_vm0, %v618_v19 }
  0x23   :  { %430 = vmatmul.msk.f32.vlgmr.msra.gmra.mxu1 %vm63_vm0, %v629_v42 }
  0x24   :  { %v282_v44 = vsel %vm129_vm2, %v244_v43, %v243_v41 }
  0x25   :  { %433 = vmatmul.msk.f32.vlgmr.msra.gmra.mxu3 %vm63_vm0, %v282_v44 }
  0x93   :  { %v119_v45 = vpop.f32.mrf.mxu0 }
  0x94   :  { %449 = vtanh.f32 %v119_v45 }
  0x9a   :  { %v450_v50 = vpop.eup %449 }
  0x9b   :  { %v122_v48 = vpop.f32.mrf.mxu0 }
  0x9d   :  { %v272_v46 = vpop.f32.mrf.mxu2 }
  0xa0   :  { %v150_v47 = vpop.f32.mrf.mxu1 }
  0xa1   :  { %451 = vtanh.f32 %v150_v47 }
  0xa2   :  { %453 = vtanh.f32 %v122_v48 }
  0xa3   :  { %455 = vtanh.f32 %v272_v46 }
  0xa5   :  { %v275_v56 = vpop.f32.mrf.mxu2 }
  0xa7   :  { %v452_v51 = vpop.eup %451 }
  0xa8   :  { %v155_v52 = vrot.slane %v452_v51, 1  ;;  %v302_v53 = vpop.f32.mrf.mxu3  ;;  %v156_v54 = vperm.slane %v452_v51, 0  ;;  %v454_v59 = vpop.eup %453 }
  0xa9   :  { %457 = vtanh.f32 %v302_v53  ;;  %v456_v61 = vpop.eup %455 }
  0xaa   :  { %v160_v57 = vmul.f32 %v450_v50, %v156_v54  ;;  %v157_v58 = vperm.slane %v155_v52, 0  ;;  %459 = vtanh.f32 %v275_v56 }
  0xac   :  { %v163_v60 = vmul.f32 %v162_v55, %v160_v57  ;;  %v161_v63 = vmul.f32 %v454_v59, %v157_v58 }
  0xae   :  { %v165_v62 = vsel %vm63_vm0, %v163_v60, 0.0  ;;  %v164_v6 = vmul.f32 %v162_v55, %v161_v63 }
  0xaf   :  { %v458_v0 = vpop.eup %457  ;;  %166 = vadd.xlane.f32.xlu0 %v165_v62 }
  0xb0   :  { %v307_v1 = vrot.slane %v458_v0, 1  ;;  %v308_v2 = vperm.slane %v458_v0, 0  ;;  %v460_v4 = vpop.eup %459  ;;  %v168_v12 = vsel %vm63_vm0, %v164_v6, 0.0 }
  0xb2   :  { %v312_v5 = vmul.f32 %v456_v61, %v308_v2  ;;  %v309_v7 = vperm.slane %v307_v1, 0 }
  0xb4   :  { %v315_v8 = vmul.f32 %v314_v3, %v312_v5  ;;  %v313_v9 = vmul.f32 %v460_v4, %v309_v7 }
  0xb6   :  { %v317_v11 = vsel %vm63_vm0, %v315_v8, 0.0  ;;  %v316_v13 = vmul.f32 %v314_v3, %v313_v9 }
  0xb7   :  { %318 = vadd.xlane.f32.xlu1 %v317_v11  ;;  %169 = vadd.xlane.f32.xlu0 %v168_v12 }
  0xb8   :  { %v320_v14 = vsel %vm63_vm0, %v316_v13, 0.0 }
  0xbf   :  { %321 = vadd.xlane.f32.xlu1 %v320_v14 }
 0x122   :  { %v167_v15 = vpop.xlane.xlu0 %166 }
 0x123   :  { %v175_v21 = vperm.slane %v167_v15, %v174_v17 }
 0x12a   :  { %v319_v18 = vpop.xlane.xlu1 %318  ;;  %v170_v20 = vpop.xlane.xlu0 %169 }
 0x12b   :  { %v176_v22 = vperm.slane %v170_v20, %v174_v17  ;;  %v325_v25 = vperm.slane %v319_v18, %v174_v17 }
 0x12d   :  { %v177_v23 = vsel %vm129_vm2, %v176_v22, %v175_v21 }
 0x12e   :  { %v180_v24 = vsel %vm179_vm3, %v177_v23, -inf }
 0x12f   :  { %181 = vmax.xlane.f32.xlu2 %v180_v24 }
 0x132   :  { %v322_v26 = vpop.xlane.xlu1 %321 }
 0x133   :  { %v326_v27 = vperm.slane %v322_v26, %v174_v17 }
 0x135   :  { %v327_v28 = vsel %vm129_vm2, %v326_v27, %v325_v25 }
 0x136   :  { %v329_v29 = vsel %vm179_vm3, %v327_v28, -inf }
 0x137   :  { %330 = vmax.xlane.f32.xlu2 %v329_v29 }
 0x1a2   :  { %v182_v31 = vpop.xlane.xlu2 %181 }
 0x1a3   :  { %v184_v32 = vperm.slane %v182_v31, 0  ;;  %v185_v33 = vperm.slane %v182_v31, 1 }
 0x1a5   :  { %v188_v34 = vsub.f32 %v167_v15, %v184_v32  ;;  %v189_v35 = vsub.f32 %v170_v20, %v185_v33 }
 0x1a7   :  { %v190_v36 = vmul.f32 1.442695, %v188_v34  ;;  %v192_v37 = vmul.f32 1.442695, %v189_v35 }
 0x1a9   :  { %461 = vpow2.f32 %v190_v36 }
 0x1aa   :  { %463 = vpow2.f32 %v192_v37  ;;  %v331_v38 = vpop.xlane.xlu2 %330 }
 0x1ab   :  { %v333_v39 = vperm.slane %v331_v38, 0  ;;  %v334_v40 = vperm.slane %v331_v38, 1 }
 0x1ad   :  { %v337_v41 = vsub.f32 %v319_v18, %v333_v39  ;;  %v338_v46 = vsub.f32 %v322_v26, %v334_v40 }
 0x1af   :  { %v462_v43 = vpop.eup %461  ;;  %v339_v44 = vmul.f32 1.442695, %v337_v41  ;;  %v341_v47 = vmul.f32 1.442695, %v338_v46 }
 0x1b0   :  { %v464_v45 = vpop.eup %463  ;;  %197 = vperm.xlu0 %444, %v462_v43  }
 0x1b1   :  { %465 = vpow2.f32 %v339_v44  ;;  %200 = vperm.xlu1 %445, %v464_v45  }
 0x1b2   :  { %467 = vpow2.f32 %v341_v47 }
 0x1b7   :  { %v466_v48 = vpop.eup %465 }
 0x1b8   :  { %346 = vperm.xlu2 %446, %v466_v48   ;;  %v468_v49 = vpop.eup %467 }
 0x1c0   :  { %349 = vperm.xlu2 %446, %v468_v49  }
 0x212   :  { %v347_v50 = vpop.permute.xlu2 %346 }
 0x213   :  { %v351_v52 = vperm.slane %v347_v50, %v174_v17 }
 0x21a   :  { %v350_v51 = vpop.permute.xlu2 %349 }
 0x21b   :  { %v352_v53 = vperm.slane %v350_v51, %v174_v17 }
 0x21d   :  { %v353_v54 = vsel %vm129_vm2, %v352_v53, %v351_v52 }
 0x21e   :  { %v355_v55 = vsel %vm179_vm3, %v353_v54, 0.0 }
 0x21f   :  { %356 = vadd.xlane.f32.xlu2 %v355_v55 }
 0x222   :  { %v198_v56 = vpop.permute.xlu0 %197 }
 0x223   :  { %v201_v57 = vpop.permute.xlu1 %200  ;;  %v202_v58 = vperm.slane %v198_v56, %v174_v17 }
 0x224   :  { %v203_v59 = vperm.slane %v201_v57, %v174_v17 }
 0x226   :  { %v204_v60 = vsel %vm129_vm2, %v203_v59, %v202_v58 }
 0x227   :  { %v206_v61 = vsel %vm179_vm3, %v204_v60, 0.0 }
 0x228   :  { %207 = vadd.xlane.f32.xlu1 %v206_v61 }
 0x292   :  { %v357_v1 = vpop.xlane.xlu2 %356 }
 0x29b   :  { %v208_v62 = vpop.xlane.xlu1 %207 }
 0x29c   :  { %469 = vrcp.f32 %v208_v62 }
 0x29d   :  { %471 = vrcp.f32 %v357_v1 }
 0x2a2   :  { %v470_v63 = vpop.eup %469 }
 0x2a3   :  { %v211_v0 = vperm.slane %v470_v63, 0  ;;  %v212_v3 = vperm.slane %v470_v63, 1  ;;  %v472_v5 = vpop.eup %471 }
 0x2a4   :  { %v360_v6 = vperm.slane %v472_v5, 0  ;;  %v361_v8 = vperm.slane %v472_v5, 1 }
 0x2a5   :  { %v215_v2 = vmul.f32 %v462_v43, %v211_v0  ;;  %v216_v4 = vmul.f32 %v464_v45, %v212_v3 }
 0x2a6   :  { %v364_v7 = vmul.f32 %v466_v48, %v360_v6  ;;  %v365_v9 = vmul.f32 %v468_v49, %v361_v8 }
 0x2a7   :  { %219 = vperm.xlu0 %444, %v215_v2  }
 0x2af   :  { %224 = vperm.xlu0 %444, %v216_v4  }
 0x2b7   :  { %368 = vperm.xlu0 %444, %v364_v7  }
 0x2bf   :  { %373 = vperm.xlu0 %444, %v365_v9  }
 0x319   :  { %v220_v11 = vpop.permute.xlu0 %219 }
 0x31a   :  { %v227_v12 = vmul.f32 %v220_v11, %v614_v10 }
 0x31c   :  { %v229_v13 = vsel %vm63_vm0, %v227_v12, 0.0 }
 0x31d   :  { %v230_v14 = vrot.slane %v229_v13, 4 }
 0x31f   :  { %v231_v15 = vadd.f32 %v230_v14, %v229_v13 }
 0x321   :  { %v225_v16 = vpop.permute.xlu0 %224  ;;  %v232_v18 = vrot.slane %v231_v15, 2 }
 0x322   :  { %v228_v17 = vmul.f32 %v225_v16, %v618_v19 }
 0x323   :  { %v233_v22 = vadd.f32 %v232_v18, %v231_v15 }
 0x324   :  { %v236_v20 = vsel %vm63_vm0, %v228_v17, 0.0 }
 0x325   :  { %v237_v21 = vrot.slane %v236_v20, 4  ;;  %v234_v27 = vrot.slane %v233_v22, 1 }
 0x327   :  { %v238_v23 = vadd.f32 %v237_v21, %v236_v20  ;;  %v235_v33 = vadd.f32 %v234_v27, %v233_v22 }
 0x329   :  { %v239_v24 = vrot.slane %v238_v23, 2  ;;  %v369_v25 = vpop.permute.xlu0 %368 }
 0x32a   :  { %v376_v26 = vmul.f32 %v369_v25, %v614_v10 }
 0x32b   :  { %v240_v28 = vadd.f32 %v239_v24, %v238_v23 }
 0x32c   :  { %v378_v29 = vsel %vm63_vm0, %v376_v26, 0.0 }
 0x32d   :  { %v241_v30 = vrot.slane %v240_v28, 1  ;;  %v379_v31 = vrot.slane %v378_v29, 4 }
 0x32f   :  { %v380_v32 = vadd.f32 %v379_v31, %v378_v29  ;;  %v242_v34 = vadd.f32 %v241_v30, %v240_v28 }
 0x331   :  { %v374_v35 = vpop.permute.xlu0 %373  ;;  %v395_v36 = vsel %vm129_vm2, %v242_v34, %v235_v33  ;;  %v381_v38 = vrot.slane %v380_v32, 2 }
 0x332   :  { %v377_v37 = vmul.f32 %v374_v35, %v618_v19  ;;  %396 = vrot.lane.b32.xlu1 %v395_v36, %s582_s0 }
 0x333   :  { %v382_v40 = vadd.f32 %v381_v38, %v380_v32 }
 0x334   :  { %v385_v39 = vsel %vm63_vm0, %v377_v37, 0.0 }
 0x335   :  { %v386_v10 = vrot.slane %v385_v39, 4  ;;  %v383_v44 = vrot.slane %v382_v40, 1 }
 0x337   :  { %v387_v41 = vadd.f32 %v386_v10, %v385_v39  ;;  %v384_v47 = vadd.f32 %v383_v44, %v382_v40 }
 0x339   :  { %v388_v43 = vrot.slane %v387_v41, 2 }
 0x33b   :  { %v389_v45 = vadd.f32 %v388_v43, %v387_v41 }
 0x33d   :  { %v390_v46 = vrot.slane %v389_v45, 1 }
 0x33f   :  { %v391_v48 = vadd.f32 %v390_v46, %v389_v45 }
 0x341   :  { %v401_v49 = vsel %vm129_vm2, %v391_v48, %v384_v47 }
 0x342   :  { %402 = vrot.lane.b32.xlu0 %v401_v49, %s583_s2 }
 0x3a4   :  { %v397_v50 = vpop.permute.xlu1 %396 }
 0x3a5   :  { %v405_v19 = vsel %vm63_vm0, %v629_v42, %v397_v50 }
 0x3b4   :  { %v403_v51 = vpop.permute.xlu0 %402 }
 0x3b5   :  { %v407_v52 = vsel %vm406_vm4, %v405_v19, %v403_v51 }
 0x3b6   :  { %409 = vst.msk [vmem:[#allocation8] sm:$0x3] %vm408_vm5, %v407_v52 }
 0x3b7   :  { %420 = dma.vmem_to_hbm [thread:$0]  %s416_s29, 32, %s418_s5, [#allocation4]  }
 0x3b8   :  { %573 = dma.done.wait [#allocation4], 32  }
 0x3b9   :  { %574 = vsyncadd [#allocation4], 4294967264 }
 0x3ba   :  { %425 = vsyncpa [#allocation3], 1 }
 0x3bb   :  { %426 = vsyncpa [#allocation6], 1 }
 0x3bc   :  { %427 = vsyncpa [#allocation4], 1 }

</bundles_post_ra>
